<compile_context>
chip_gen: v7x
topology: tpu7x:2x2x1
jax: 0.10.0
libtpu: 0.0.40
codegen_flags: <defaults>
</compile_context>

<pallas_src>
import functools

import jax
import jax.numpy as jnp
from jax.experimental import pallas as pl
from jax.experimental.pallas import tpu as pltpu


def _cem_loss_kernel(logits_ref, target_ref, sum_ref, cnt_ref, *,
                     mask_index, n_total, tile_n):
    # logits_ref: [C, TILE_N]  (classes on sublanes, samples on lanes)
    # target_ref: [1, TILE_N]  int32
    # sum_ref/cnt_ref: [1, 1]  per-tile partials
    c = logits_ref.shape[0]

    x = logits_ref[...].astype(jnp.float32)                      # [C, T]
    tgt = target_ref[...]                                        # [1, T]

    cls = jax.lax.broadcasted_iota(jnp.int32, (c, tile_n), 0)    # class id per sublane
    lane = jax.lax.broadcasted_iota(jnp.int32, (1, tile_n), 1)   # sample id within tile

    # logits_mask: class column 1 -> -1e9 (same constant as the reference).
    xm = jnp.where(cls == 1, jnp.float32(-1.0e9), x)

    # First softmax over classes (sublane axis, C entries per lane).
    m = jnp.max(xm, axis=0, keepdims=True)                       # [1, T]
    e = jnp.exp(xm - m)                                          # [C, T]  (EUP)
    inv_s = 1.0 / jnp.sum(e, axis=0, keepdims=True)              # one divide per sample
    p = e * inv_s                                                # [C, T]

    # -log_softmax(p)[target]:  p in [0, 1] so log-sum-exp needs no max shift.
    lse = jnp.log(jnp.sum(jnp.exp(p), axis=0, keepdims=True))    # [1, T]  (EUP)
    p_t = jnp.sum(jnp.where(cls == tgt, p, 0.0), axis=0, keepdims=True)
    per_row = lse - p_t                                          # [1, T]

    # loss_mask: drop rows with target == mask_index; also drop padded tail lanes.
    row = pl.program_id(0) * tile_n + lane
    keep = (tgt != mask_index) & (row < n_total)                 # [1, T] bool

    # jnp.where (select) keeps NaN/garbage from padded lanes out of the sums.
    sum_ref[...] = jnp.sum(jnp.where(keep, per_row, 0.0), axis=1, keepdims=True)
    cnt_ref[...] = jnp.sum(keep.astype(jnp.float32), axis=1, keepdims=True)


@functools.partial(jax.jit, static_argnames=("mask_index", "tile_n"))
def cem_loss(logits, target, mask_index=3, tile_n=32768):
    n, c = logits.shape

    # Lane-dense layout: classes on sublanes, samples on lanes.  Native dtype
    # stays in HBM; the kernel upcasts in-vreg.
    # TODO(synk): the XLA transpose is one extra HBM round trip of the logits;
    # it could be removed with an in-kernel de-interleave (or allow_input_fusion)
    # if profiling ever shows it dominating for very large N.
    logits_t = logits.T                                   # [C, N]
    target2d = target.reshape(1, n).astype(jnp.int32)     # [1, N]

    if n <= tile_n:
        tile_n = n                                        # single (full-dim) block
    else:
        tile_n = max(128, (tile_n // 128) * 128)          # keep lane dim 128-aligned
    grid_n = pl.cdiv(n, tile_n)

    kernel = functools.partial(_cem_loss_kernel, mask_index=mask_index,
                               n_total=n, tile_n=tile_n)

    # Advisory cost hint for XLA's scheduler around the custom call.
    bytes_in = logits.size * logits.dtype.itemsize + n * 4
    cost = pl.CostEstimate(
        flops=10 * n * c,
        transcendentals=2 * n * c + 2 * n,
        bytes_accessed=bytes_in + 8 * grid_n,
    )

    part_sum, part_cnt = pl.pallas_call(
        kernel,
        out_shape=(
            jax.ShapeDtypeStruct((grid_n, 1, 1), jnp.float32),
            jax.ShapeDtypeStruct((grid_n, 1, 1), jnp.float32),
        ),
        grid=(grid_n,),
        in_specs=[
            pl.BlockSpec((c, tile_n), lambda i: (0, i)),
            pl.BlockSpec((1, tile_n), lambda i: (0, i)),
        ],
        out_specs=(
            pl.BlockSpec((None, 1, 1), lambda i: (i, 0, 0)),
            pl.BlockSpec((None, 1, 1), lambda i: (i, 0, 0)),
        ),
        compiler_params=pltpu.CompilerParams(
            dimension_semantics=("parallel",),
            vmem_limit_bytes=32 * 1024 * 1024,
        ),
        cost_estimate=cost,
    )(logits_t, target2d)

    # Final tiny reduction over per-tile partials (keeps the grid axis parallel
    # so v7x can shard tiles across both TensorCores).
    # NOTE: if every row has target == mask_index this divides by zero, exactly
    # like the PyTorch reference (mean over an empty selection).
    return jnp.sum(part_sum) / jnp.sum(part_cnt)


def _cem_loss_ref(logits, target, mask_index=3):
    # Pure-JAX reference for correctness checking.
    n, c = logits.shape
    col = jnp.arange(c)[None, :]
    masked = jnp.where(col == 1, -1.0e9, logits.astype(jnp.float32))
    p = jax.nn.softmax(masked, axis=1)
    neg_log = -jax.nn.log_softmax(p, axis=1)
    one_hot = jax.nn.one_hot(target, c, dtype=jnp.float32)
    per_row = jnp.sum(neg_log * one_hot, axis=1)
    keep = (target != mask_index).astype(jnp.float32)
    return jnp.sum(per_row * keep) / jnp.sum(keep)


if __name__ == "__main__":
    key = jax.random.PRNGKey(0)
    k1, k2, k3, k4 = jax.random.split(key, 4)

    # Small single-tile case: 8 samples, 4 classes.
    N, C = 8, 4
    logits = jax.random.normal(k1, (N, C), dtype=jnp.float32)
    target = jax.random.randint(k2, (N,), 0, C, dtype=jnp.int32)
    target = target.at[0].set(0)   # ensure at least one unmasked row

    loss = jax.block_until_ready(cem_loss(logits, target, mask_index=3))
    ref = _cem_loss_ref(logits, target, mask_index=3)
    assert jnp.allclose(loss, ref, rtol=1e-5, atol=1e-5), (loss, ref)

    # Multi-tile + ragged-tail case exercising the tiled/parallel path.
    N2, C2 = 300, 4
    logits2 = jax.random.normal(k3, (N2, C2), dtype=jnp.float32)
    target2 = jax.random.randint(k4, (N2,), 0, C2, dtype=jnp.int32)
    target2 = target2.at[0].set(0)
    loss2 = jax.block_until_ready(
        cem_loss(logits2, target2, mask_index=3, tile_n=128))
    ref2 = _cem_loss_ref(logits2, target2, mask_index=3)
    assert jnp.allclose(loss2, ref2, rtol=1e-5, atol=1e-5), (loss2, ref2)

    print("KERNEL_OK")
</pallas_src>

<mosaic_0001>
module attributes {stable_mosaic.version = 11 : i64} {
  func.func @_cem_loss_kernel(%arg0: i32, %arg1: memref<4x8xf32, #tpu.memory_space<vmem>>, %arg2: memref<1x8xi32, #tpu.memory_space<vmem>>, %arg3: memref<1x1x1xf32, #tpu.memory_space<vmem>>, %arg4: memref<1x1x1xf32, #tpu.memory_space<vmem>>) attributes {dimension_semantics = [#tpu.dimension_semantics<parallel>], iteration_bounds = array<i64: 1>, scalar_prefetch = 0 : i64, scratch_operands = 0 : i64, tpu.core_type = #tpu.core_type<tc>, window_params = [{transform_indices = @transform_0, window_bounds = array<i64: 4, 8>}, {transform_indices = @transform_1, window_bounds = array<i64: 1, 8>}, {transform_indices = @transform_2, window_bounds = array<i64: 1, 1, 1>}, {transform_indices = @transform_3, window_bounds = array<i64: 1, 1, 1>}]} {
    %c0 = arith.constant 0 : index
    %c0_0 = arith.constant 0 : index
    %0 = vector.load %arg1[%c0, %c0_0] : memref<4x8xf32, #tpu.memory_space<vmem>>, vector<4x8xf32>
    %c0_1 = arith.constant 0 : index
    %c0_2 = arith.constant 0 : index
    %1 = vector.load %arg2[%c0_1, %c0_2] : memref<1x8xi32, #tpu.memory_space<vmem>>, vector<1x8xi32>
    %2 = tpu.iota {dimensions = array<i32: 0>} : vector<4x8xi32>
    %3 = tpu.iota {dimensions = array<i32: 1>} : vector<1x8xi32>
    %c1_i32 = arith.constant 1 : i32
    %4 = vector.broadcast %c1_i32 : i32 to vector<4x8xi32>
    %5 = arith.cmpi eq, %2, %4 : vector<4x8xi32>
    %cst = arith.constant -1.000000e+09 : f32
    %6 = vector.broadcast %cst : f32 to vector<4x8xf32>
    %7 = arith.select %5, %6, %0 : vector<4x8xi1>, vector<4x8xf32>
    %cst_3 = arith.constant dense<0xFF800000> : vector<8xf32>
    %8 = vector.multi_reduction <maximumf>, %7, %cst_3 [0] : vector<4x8xf32> to vector<8xf32>
    %9 = vector.shape_cast %8 : vector<8xf32> to vector<1x8xf32>
    %10 = vector.broadcast %9 : vector<1x8xf32> to vector<4x8xf32>
    %11 = arith.subf %7, %10 : vector<4x8xf32>
    %12 = math.exp %11 : vector<4x8xf32>
    %cst_4 = arith.constant dense<0.000000e+00> : vector<8xf32>
    %13 = vector.multi_reduction <add>, %12, %cst_4 [0] : vector<4x8xf32> to vector<8xf32>
    %14 = vector.shape_cast %13 : vector<8xf32> to vector<1x8xf32>
    %cst_5 = arith.constant 1.000000e+00 : f32
    %15 = vector.broadcast %cst_5 : f32 to vector<1x8xf32>
    %16 = arith.divf %15, %14 : vector<1x8xf32>
    %17 = vector.broadcast %16 : vector<1x8xf32> to vector<4x8xf32>
    %18 = arith.mulf %12, %17 : vector<4x8xf32>
    %19 = math.exp %18 : vector<4x8xf32>
    %cst_6 = arith.constant dense<0.000000e+00> : vector<8xf32>
    %20 = vector.multi_reduction <add>, %19, %cst_6 [0] : vector<4x8xf32> to vector<8xf32>
    %21 = vector.shape_cast %20 : vector<8xf32> to vector<1x8xf32>
    %22 = math.log %21 : vector<1x8xf32>
    %23 = vector.broadcast %1 : vector<1x8xi32> to vector<4x8xi32>
    %24 = arith.cmpi eq, %2, %23 : vector<4x8xi32>
    %cst_7 = arith.constant 0.000000e+00 : f32
    %25 = vector.broadcast %cst_7 : f32 to vector<4x8xf32>
    %26 = arith.select %24, %18, %25 : vector<4x8xi1>, vector<4x8xf32>
    %cst_8 = arith.constant dense<0.000000e+00> : vector<8xf32>
    %27 = vector.multi_reduction <add>, %26, %cst_8 [0] : vector<4x8xf32> to vector<8xf32>
    %28 = vector.shape_cast %27 : vector<8xf32> to vector<1x8xf32>
    %29 = arith.subf %22, %28 : vector<1x8xf32>
    %c8_i32 = arith.constant 8 : i32
    %30 = arith.muli %arg0, %c8_i32 : i32
    %31 = vector.broadcast %30 : i32 to vector<1x8xi32>
    %32 = arith.addi %31, %3 : vector<1x8xi32>
    %c3_i32 = arith.constant 3 : i32
    %33 = vector.broadcast %c3_i32 : i32 to vector<1x8xi32>
    %34 = arith.cmpi ne, %1, %33 : vector<1x8xi32>
    %c8_i32_9 = arith.constant 8 : i32
    %35 = vector.broadcast %c8_i32_9 : i32 to vector<1x8xi32>
    %36 = arith.cmpi slt, %32, %35 : vector<1x8xi32>
    %37 = arith.andi %34, %36 : vector<1x8xi1>
    %cst_10 = arith.constant 0.000000e+00 : f32
    %38 = vector.broadcast %cst_10 : f32 to vector<1x8xf32>
    %39 = arith.select %37, %29, %38 : vector<1x8xi1>, vector<1x8xf32>
    %cst_11 = arith.constant dense<0.000000e+00> : vector<1xf32>
    %40 = vector.multi_reduction <add>, %39, %cst_11 [1] : vector<1x8xf32> to vector<1xf32>
    %41 = vector.shape_cast %40 : vector<1xf32> to vector<1x1xf32>
    %c0_12 = arith.constant 0 : index
    %c0_13 = arith.constant 0 : index
    %c0_14 = arith.constant 0 : index
    %42 = vector.load %arg3[%c0_12, %c0_13, %c0_14] : memref<1x1x1xf32, #tpu.memory_space<vmem>>, vector<1x1x1xf32>
    %43 = vector.shape_cast %42 : vector<1x1x1xf32> to vector<1x1xf32>
    %44 = vector.shape_cast %41 : vector<1x1xf32> to vector<1x1x1xf32>
    tpu.vector_store %arg3[%c0_12, %c0_13, %c0_14], %44 {strides = array<i32>} : memref<1x1x1xf32, #tpu.memory_space<vmem>>, vector<1x1x1xf32>,
    %45 = arith.extui %37 : vector<1x8xi1> to vector<1x8xi32>
    %46 = arith.sitofp %45 : vector<1x8xi32> to vector<1x8xf32>
    %cst_15 = arith.constant dense<0.000000e+00> : vector<1xf32>
    %47 = vector.multi_reduction <add>, %46, %cst_15 [1] : vector<1x8xf32> to vector<1xf32>
    %48 = vector.shape_cast %47 : vector<1xf32> to vector<1x1xf32>
    %c0_16 = arith.constant 0 : index
    %c0_17 = arith.constant 0 : index
    %c0_18 = arith.constant 0 : index
    %49 = vector.load %arg4[%c0_16, %c0_17, %c0_18] : memref<1x1x1xf32, #tpu.memory_space<vmem>>, vector<1x1x1xf32>
    %50 = vector.shape_cast %49 : vector<1x1x1xf32> to vector<1x1xf32>
    %51 = vector.shape_cast %48 : vector<1x1xf32> to vector<1x1x1xf32>
    tpu.vector_store %arg4[%c0_16, %c0_17, %c0_18], %51 {strides = array<i32>} : memref<1x1x1xf32, #tpu.memory_space<vmem>>, vector<1x1x1xf32>,
    return
  }
  func.func @transform_0(%arg0: i32) -> (i32, i32) {
    %c0_i32 = arith.constant 0 : i32
    %c0_i32_0 = arith.constant 0 : i32
    return %c0_i32, %arg0 : i32, i32
  }
  func.func @transform_1(%arg0: i32) -> (i32, i32) {
    %c0_i32 = arith.constant 0 : i32
    %c0_i32_0 = arith.constant 0 : i32
    return %c0_i32, %arg0 : i32, i32
  }
  func.func @transform_2(%arg0: i32) -> (i32, i32, i32) {
    %c0_i32 = arith.constant 0 : i32
    %c0_i32_0 = arith.constant 0 : i32
    %c0_i32_1 = arith.constant 0 : i32
    return %arg0, %c0_i32, %c0_i32_0 : i32, i32, i32
  }
  func.func @transform_3(%arg0: i32) -> (i32, i32, i32) {
    %c0_i32 = arith.constant 0 : i32
    %c0_i32_0 = arith.constant 0 : i32
    %c0_i32_1 = arith.constant 0 : i32
    return %arg0, %c0_i32, %c0_i32_0 : i32, i32, i32
  }
}

</mosaic_0001>

<bundles_post_ra>
// kernel: cem_loss.1
= control target key start
LH: loop header
LB: loop body
LE: loop exit
PB: predicated region body
PF: predicated region fallthrough
CT: control target
= control target key end

     0   :  { %9 = vsyncpa [#allocation3], 0  ;;  %v17_v0 = vlaneseq  ;;  %s235_s0 = inlined_call_operand.vmem [shape: f32[4,8], index: 0, kind: input, shape index: {}]   ;;  %s236_s1 = inlined_call_operand.vmem [shape: s32[1,8], index: 1, kind: input, shape index: {}]   ;;  %s237_s2 = inlined_call_operand.hbm [shape: f32[1,1,1], index: 2, kind: output, shape index: {0}]   ;;  %s238_s3 = inlined_call_operand.hbm [shape: f32[1,1,1], index: 3, kind: output, shape index: {1}]  }
   0x1   :  { %10 = vsyncpa [#allocation5], 0  ;;  %v15_v1 = vld [vmem:[%s235_s0] sm:$0xf]  ;;  %vm23_vm0 = vcmask 60416   ;;  %vm76_vm6 = vcmask 57344  }
   0x2   :  { %v18_v2 = vshrl.u32 %v17_v0, 7  ;;  %v16_v24 = vld [vmem:[%s236_s1] sm:$0x1]  ;;  %v20_v41 = vand.u32 127, %v17_v0  ;;  %v176_v48 = vmov 0.0   ;;  %s177_s1 = smov [#allocation2]  }
   0x3   :  { %vm72_vm3 = vcmp.ne.s32.totalorder %v16_v24, 3  ;;  %s94_s15 = sshll.u32 %s177_s1, 4  ;;  %vm80_vm7 = vcmask 0   ;;  %s178_s16 = smov [#allocation4]   ;;  %s95_s15 = int_to_ptr.vmem [resolvable:$true] %s94_s15 }
   0x4   :  { %vm21_vm1 = vcmp.eq.s32.totalorder %v18_v2, 1  ;;  %v57_v23 = vsub.s32 0, %v18_v2  ;;  %vm73_vm4 = vcmp.lt.s32.totalorder %v20_v41, 8  ;;  %s104_s17 = sshll.u32 %s178_s16, 4  ;;  %s128_s18 = scalar_lea.vmem %s95_s15, 16  ;;  %s105_s17 = int_to_ptr.vmem [resolvable:$true] %s104_s17 }
   0x5   :  { %v22_v3 = vsel %vm21_vm1, -1e+09, %v15_v1  ;;  %vm74_vm5 = vmand %vm72_vm3, %vm73_vm4  ;;  %p129_p0 = scmp.ne.s32.totalorder %s95_s15, %s128_s18  ;;  %s132_s19 = scalar_lea.vmem %s95_s15, 32 }
   0x6   :  { %v24_v4 = vsel %vm23_vm0, %v22_v3, -inf  ;;  %v58_v26 = vrot.slane %v16_v24, %v57_v23  ;;  %v116_v49 = vsel %vm74_vm5, 1.0, %v176_v48  ;;  %p133_p1 = scmp.lt.s32.totalorder %s95_s15, %s95_s15  ;;  %p134_p2 = scmp.lt.s32.totalorder %s132_s19, %s128_s18 }
   0x7   :  { %v25_v5 = vrot.slane %v24_v4, 4  ;;  %v84_v51 = vsel %vm76_vm6, %v116_v49, 0.0 }
   0x8   :  { %vm59_vm2 = vcmp.eq.s32.totalorder %v18_v2, %v58_v26  ;;  %p135_p3 = por %p134_p2, %p133_p1 }
   0x9   :  { %v26_v6 = vmax.f32 %v24_v4, %v25_v5 }
   0xa   :  { %p136_p4 = pnand %p135_p3, %p129_p0 }
   0xb   :  { %v27_v7 = vrot.slane %v26_v6, 2 }
   0xd   :  { %v28_v8 = vmax.f32 %v26_v6, %v27_v7 }
   0xf   :  { %v29_v9 = vrot.slane %v28_v8, 1 }
  0x11   :  { %v30_v10 = vmax.f32 %v28_v8, %v29_v9 }
  0x13   :  { %v31_v11 = vsub.f32 %v22_v3, %v30_v10 }
  0x15   :  { %v32_v12 = vmul.f32 1.442695, %v31_v11 }
  0x17   :  { %120 = vpow2.f32 %v32_v12 }
  0x21   :  { %v121_v13 = vpop.eup %120 }
  0x22   :  { %v34_v14 = vsel %vm23_vm0, %v121_v13, 0.0 }
  0x23   :  { %v35_v15 = vrot.slane %v34_v14, 4 }
  0x25   :  { %v36_v16 = vadd.f32 %v35_v15, %v34_v14 }
  0x27   :  { %v37_v17 = vrot.slane %v36_v16, 2 }
  0x29   :  { %v38_v18 = vadd.f32 %v37_v17, %v36_v16 }
  0x2b   :  { %v39_v19 = vrot.slane %v38_v18, 1 }
  0x2d   :  { %v40_v20 = vadd.f32 %v39_v19, %v38_v18 }
  0x2f   :  { %122 = vrcp.f32 %v40_v20 }
  0x39   :  { %v123_v21 = vpop.eup %122 }
  0x3a   :  { %v43_v22 = vmul.f32 %v123_v21, %v121_v13 }
  0x3c   :  { %v44_v25 = vmul.f32 1.442695, %v43_v22  ;;  %v60_v27 = vsel %vm59_vm2, %v43_v22, 0.0 }
  0x3d   :  { %v61_v29 = vsel %vm23_vm0, %v60_v27, 0.0 }
  0x3e   :  { %124 = vpow2.f32 %v44_v25  ;;  %v62_v32 = vrot.slane %v61_v29, 4 }
  0x40   :  { %v63_v35 = vadd.f32 %v62_v32, %v61_v29 }
  0x42   :  { %v64_v38 = vrot.slane %v63_v35, 2 }
  0x44   :  { %v65_v40 = vadd.f32 %v64_v38, %v63_v35 }
  0x46   :  { %v66_v42 = vrot.slane %v65_v40, 1 }
  0x48   :  { %v125_v28 = vpop.eup %124  ;;  %v67_v43 = vadd.f32 %v66_v42, %v65_v40 }
  0x49   :  { %v46_v30 = vsel %vm23_vm0, %v125_v28, 0.0 }
  0x4a   :  { %v47_v31 = vrot.slane %v46_v30, 4 }
  0x4c   :  { %v48_v33 = vadd.f32 %v47_v31, %v46_v30 }
  0x4e   :  { %v49_v34 = vrot.slane %v48_v33, 2 }
  0x50   :  { %v50_v36 = vadd.f32 %v49_v34, %v48_v33 }
  0x52   :  { %v51_v37 = vrot.slane %v50_v36, 1 }
  0x54   :  { %v52_v39 = vadd.f32 %v51_v37, %v50_v36 }
  0x56   :  { %126 = vlog2.f32 %v52_v39 }
  0x60   :  { %v127_v44 = vpop.eup %126 }
  0x61   :  { %v54_v45 = vmul.f32 0.6931472, %v127_v44 }
  0x63   :  { %v68_v46 = vsub.f32 %v54_v45, %v67_v43 }
  0x65   :  { %v75_v47 = vsel %vm74_vm5, %v68_v46, 0.0 }
  0x66   :  { %v77_v50 = vsel %vm76_vm6, %v75_v47, 0.0 }
  0x67   :  { %78 = vadd.xlane.f32.xlu0 %v77_v50 }
  0x6b   :  { %85 = vadd.xlane.f32.xlu0 %v84_v51 }
  0xf4   :  { %v79_v52 = vpop.xlane.xlu0 %78 }
  0xf5   :  { %81 = vst.msk [vmem:[#allocation2] sm:$0x1] %vm80_vm7, %v79_v52 }
  0xf6   :  { %139 = shalt.err (!%p136_p4)
}
  0xf7   :  { %s140_s22 = scalar_lea.hbm %s237_s2, 16 }
  0xf8   :  { %p141_p5 = scmp.ne.s32.totalorder %s237_s2, %s140_s22  ;;  %p144_p6 = scmp.lt.u32.totalorder %s140_s22, %s237_s2 }
  0xfa   :  { %p146_p7 = pnand %p144_p6, %p141_p5 }
  0xfc   :  { %149 = shalt.err (!%p146_p7)
}
  0xfd   :  { %97 = dma.vmem_to_hbm [thread:$0]  %s95_s15, 16, %s237_s2, [#allocation3]   ;;  %v86_v53 = vpop.xlane.xlu0 %85 }
  0xfe   :  { %87 = vst.msk [vmem:[#allocation4] sm:$0x1] %vm80_vm7, %v86_v53  ;;  %s150_s29 = scalar_lea.vmem %s105_s17, 16  ;;  %s154_s30 = scalar_lea.vmem %s105_s17, 32 }
  0xff   :  { %p151_p8 = scmp.ne.s32.totalorder %s105_s17, %s150_s29  ;;  %p155_p9 = scmp.lt.s32.totalorder %s105_s17, %s105_s17 }
 0x100   :  { %p156_p10 = scmp.lt.s32.totalorder %s154_s30, %s150_s29 }
 0x102   :  { %p157_p11 = por %p156_p10, %p155_p9 }
 0x104   :  { %p158_p12 = pnand %p157_p11, %p151_p8 }
 0x106   :  { %161 = shalt.err (!%p158_p12)
}
 0x107   :  { %s162_s6 = scalar_lea.hbm %s238_s3, 16 }
 0x108   :  { %p163_p13 = scmp.ne.s32.totalorder %s238_s3, %s162_s6  ;;  %p166_p0 = scmp.lt.u32.totalorder %s162_s6, %s238_s3 }
 0x10a   :  { %p168_p1 = pnand %p166_p0, %p163_p13 }
 0x10c   :  { %171 = shalt.err (!%p168_p1)
}
 0x10d   :  { %107 = dma.vmem_to_hbm [thread:$0]  %s105_s17, 16, %s238_s3, [#allocation5]  }
 0x10e   :  { %172 = dma.done.wait [#allocation3], 16  }
 0x10f   :  { %173 = vsyncadd [#allocation3], 4294967280 }
 0x110   :  { %174 = dma.done.wait [#allocation5], 16  }
 0x111   :  { %175 = vsyncadd [#allocation5], 4294967280 }
 0x112   :  { %114 = vsyncpa [#allocation3], 1 }
 0x113   :  { %115 = vsyncpa [#allocation5], 1 }

</bundles_post_ra>
